<compile_context>
chip_gen: v7x
topology: tpu7x:2x2x1
jax: 0.10.0
libtpu: 0.0.40
codegen_flags: <defaults>
</compile_context>

<pallas_src>
import jax
import jax.numpy as jnp
from jax import lax
from jax.experimental import pallas as pl
from jax.experimental.pallas import tpu as pltpu


def _round_up(x, m):
    return ((x + m - 1) // m) * m


# ----------------------------- Pallas kernel -----------------------------

def mlp_kernel(tok_ref, wfold_ref, b1_ref, w2_ref, b2_ref, out_ref):
    # tok_ref:   (tm, K)       int32  shifted token ids (context slot k)
    # wfold_ref: (K, V1p, Hp)  bf16   wte folded into the first Linear
    # b1_ref:    (1, Hp)       f32    (padded entries zero)
    # w2_ref:    (Hp, Vp)      bf16   (padded rows/cols zero)
    # b2_ref:    (1, Vp)       f32    (padded entries zero)
    # out_ref:   (tm, Vp)      f32
    tm = out_ref.shape[0]
    K = tok_ref.shape[1]
    V1p = wfold_ref.shape[1]
    Hp = wfold_ref.shape[2]

    tok = tok_ref[...]                                          # (tm, K) int32
    vocab_iota = lax.broadcasted_iota(jnp.int32, (1, V1p), 1)   # (1, V1p)

    # Embedding "gather" + first matmul as K one-hot MXU matmuls (gathers are
    # slow on TPU; a lane-dense one-hot matmul is not).  K is small & static.
    h = jnp.zeros((tm, Hp), jnp.float32)
    for k in range(K):
        onehot = jnp.where(tok[:, k:k + 1] == vocab_iota, 1.0, 0.0)  # (tm, V1p) f32
        h = h + jnp.dot(onehot.astype(jnp.bfloat16), wfold_ref[k],
                        preferred_element_type=jnp.float32)

    h = jnp.tanh(h + b1_ref[...])                               # f32 epilogue (EUP tanh)
    y = jnp.dot(h.astype(jnp.bfloat16), w2_ref[...],
                preferred_element_type=jnp.float32)
    out_ref[...] = (y + b2_ref[...]).astype(out_ref.dtype)


# ------------------------------ wrapper -----------------------------------

def _pick_row_tile(n_rows):
    """Largest aligned row tile; prefer >= 2 grid steps (2 TensorCores on v7x)."""
    for cand in (512, 256, 128):
        if n_rows >= 2 * cand:
            return cand
    if n_rows >= 16:
        return _round_up((n_rows + 1) // 2, 8)   # two parallel steps
    return max(8, _round_up(n_rows, 8))          # tiny: single step


def mlp_pallas(tokens, wfold, b1, w2_t, b2, v_out):
    """tokens: (N, K) int32 -> logits (N, v_out) f32."""
    N, K = tokens.shape
    _, V1p, Hp = wfold.shape
    Vp = w2_t.shape[1]

    tm = _pick_row_tile(N)

    # VMEM budget: resident weights + double-buffered token/out tiles.
    resident = wfold.size * 2 + w2_t.size * 2 + (b1.size + b2.size) * 4
    tile_bytes = lambda t: 2 * (t * K * 4) + 2 * (t * Vp * 4)
    budget = 24 * 1024 * 1024                   # safe vs 32 MiB scoped default
    while tm > 8 and resident + tile_bytes(tm) > budget:
        tm = max(8, _round_up(tm // 2, 8))

    N_pad = _round_up(N, tm)
    if N_pad != N:
        tokens = jnp.pad(tokens, ((0, N_pad - N), (0, 0)))
    grid = (N_pad // tm,)

    needed = resident + tile_bytes(tm)
    vmem_limit = int(min(64 * 1024 * 1024, max(2 * needed, 16 * 1024 * 1024)))

    flops = 2 * N_pad * (K * V1p * Hp + Hp * Vp)
    bytes_accessed = (N_pad * K * 4 + wfold.size * 2 + w2_t.size * 2
                      + (b1.size + b2.size) * 4 + N_pad * Vp * 4)

    out = pl.pallas_call(
        mlp_kernel,
        out_shape=jax.ShapeDtypeStruct((N_pad, Vp), jnp.float32),
        grid_spec=pltpu.PrefetchScalarGridSpec(
            num_scalar_prefetch=0,
            grid=grid,
            in_specs=[
                pl.BlockSpec((tm, K), lambda i: (i, 0)),            # token row tile
                # Constant operands: whole-array VMEM residents (single
                # buffer, DMA'd once, no per-step double-buffering).
                pl.BlockSpec(memory_space=pltpu.MemorySpace.VMEM),  # wfold
                pl.BlockSpec(memory_space=pltpu.MemorySpace.VMEM),  # b1
                pl.BlockSpec(memory_space=pltpu.MemorySpace.VMEM),  # w2
                pl.BlockSpec(memory_space=pltpu.MemorySpace.VMEM),  # b2
            ],
            out_specs=pl.BlockSpec((tm, Vp), lambda i: (i, 0)),
        ),
        compiler_params=pltpu.CompilerParams(
            dimension_semantics=("parallel",),
            vmem_limit_bytes=vmem_limit),
        cost_estimate=pl.CostEstimate(
            flops=flops,
            transcendentals=N_pad * Hp,
            bytes_accessed=bytes_accessed),
    )(tokens, wfold, b1, w2_t, b2)

    return out[:N, :v_out]


# ----------------------------- Model wrapper -----------------------------

class MLPModel:
    def __init__(self, max_length, vocab_size, embedding_dimension,
                 hidden_dimension, key):
        self.block_size = max_length + 1
        self.vocab_size = vocab_size
        self.embedding_dimension = embedding_dimension
        K, E, H, V = self.block_size, embedding_dimension, hidden_dimension, vocab_size
        D_in = K * E
        self.d_in = D_in
        Hp = _round_up(H, 128)
        Vp = _round_up(V, 128)
        V1p = _round_up(V + 1, 128)

        k_wte, k_w1, k_b1, k_w2, k_b2 = jax.random.split(key, 5)

        # nn.Embedding(V + 1, E): default init N(0, 1)
        self.wte = jax.random.normal(k_wte, (V + 1, E), jnp.float32)

        # nn.Linear(D_in, H): weight (H, D_in), bias (H), U(+-1/sqrt(D_in))
        lim1 = 1.0 / (D_in ** 0.5)
        w1 = jax.random.uniform(k_w1, (H, D_in), jnp.float32, -lim1, lim1)
        b1 = jax.random.uniform(k_b1, (H,), jnp.float32, -lim1, lim1)

        # nn.Linear(H, V)
        lim2 = 1.0 / (H ** 0.5)
        w2 = jax.random.uniform(k_w2, (V, H), jnp.float32, -lim2, lim2)
        b2 = jax.random.uniform(k_b2, (V,), jnp.float32, -lim2, lim2)

        # Unpadded f32 copies for the pure-JAX reference check.
        self.w1_t_f32 = w1.T
        self.b1_f32 = b1
        self.w2_t_f32 = w2.T
        self.b2_f32 = b2

        # Fold wte into the first Linear:  x @ W1^T == sum_k wte[tok_k] @ W1_blk_k.
        # The fold is done in f32 so the kernel only incurs one bf16 rounding
        # per (token, k) term.  Padded rows/cols are exactly zero.
        w1_blocks = w1.T.reshape(K, E, H)                          # (K, E, H)
        folded = jnp.einsum('ve,keh->kvh', self.wte, w1_blocks)    # (K, V+1, H)
        wfold = jnp.zeros((K, V1p, Hp), jnp.float32).at[:, :V + 1, :H].set(folded)
        self.wfold = wfold.astype(jnp.bfloat16)                    # MXU operand

        self.b1_pad = jnp.zeros((1, Hp), jnp.float32).at[0, :H].set(b1)
        w2_t_pad = jnp.zeros((Hp, Vp), jnp.float32).at[:H, :V].set(w2.T)
        self.w2_t = w2_t_pad.astype(jnp.bfloat16)                  # MXU operand
        self.b2_pad = jnp.zeros((1, Vp), jnp.float32).at[0, :V].set(b2)

    def get_block_size(self):
        return self.block_size

    def _build_tokens(self, idx):
        """Shifted token matrix replicating the torch roll loop.

        tokens[b, t, k] = idx[b, t-k] for t >= k, else vocab_size.
        Pure int32 index arithmetic on a (B, T) array — negligible glue.
        """
        B, T = idx.shape
        K = self.block_size
        t = jnp.arange(T)[:, None]                    # (T, 1)
        k = jnp.arange(K)[None, :]                    # (1, K)
        src = t - k                                   # (T, K)
        valid = src >= 0
        src_c = jnp.where(valid, src, 0)
        toks = jnp.where(valid[None, :, :], idx[:, src_c], self.vocab_size)
        return toks.astype(jnp.int32)                 # (B, T, K)

    def _build_features(self, idx):
        """Reference-only: explicit embedding gather + concat (not on the fast path)."""
        B, T = idx.shape
        toks = self._build_tokens(idx)
        emb = jnp.take(self.wte, toks, axis=0)        # (B, T, K, E)
        return emb.reshape(B, T, self.block_size * self.embedding_dimension)

    def forward(self, idx, targets=None):
        B, T = idx.shape
        tokens = self._build_tokens(idx).reshape(B * T, self.block_size)
        logits_flat = mlp_pallas(tokens, self.wfold, self.b1_pad,
                                 self.w2_t, self.b2_pad, self.vocab_size)
        logits = logits_flat.reshape(B, T, self.vocab_size)

        loss = None
        if targets is not None:
            # TODO(synk): cross-entropy kept in plain JAX glue (softmax over a
            # 16-wide vocab is not worth fusing into the kernel at these sizes).
            t_flat = targets.reshape(-1)
            mask = t_flat != -1
            logp = jax.nn.log_softmax(logits_flat, axis=-1)
            safe_t = jnp.where(mask, t_flat, 0)
            nll = -jnp.take_along_axis(logp, safe_t[:, None], axis=1)[:, 0]
            loss = jnp.sum(jnp.where(mask, nll, 0.0)) / jnp.maximum(
                jnp.sum(mask.astype(jnp.float32)), 1.0)
        return logits, loss


# --------------------------------- main -----------------------------------

if __name__ == "__main__":
    key = jax.random.PRNGKey(0)
    k_param, k_idx = jax.random.split(key)

    max_length = 7          # -> block_size = 8
    vocab_size = 16
    embedding_dimension = 16
    hidden_dimension = 32
    B, T = 2, 8

    model = MLPModel(max_length, vocab_size, embedding_dimension,
                     hidden_dimension, k_param)

    idx = jax.random.randint(k_idx, (B, T), 0, vocab_size, dtype=jnp.int32)

    logits, loss = model.forward(idx)
    logits = jax.block_until_ready(logits)

    # Sanity: pure-JAX f32 reference of the same math (kernel uses bf16 MXU
    # operands with f32 accumulation, so allow a loose tolerance).
    x = model._build_features(idx).reshape(B * T, -1)
    ref = jnp.tanh(x @ model.w1_t_f32 + model.b1_f32) @ model.w2_t_f32 + model.b2_f32
    ref = ref.reshape(B, T, vocab_size)
    assert logits.shape == (B, T, vocab_size)
    assert jnp.allclose(logits, ref, atol=2e-2, rtol=2e-2), (
        float(jnp.max(jnp.abs(logits - ref))))

    # Exercise the targets / loss path once too.
    tgt = jax.random.randint(jax.random.PRNGKey(1), (B, T), 0, vocab_size,
                             dtype=jnp.int32)
    _, loss = model.forward(idx, tgt)
    loss = jax.block_until_ready(loss)
    assert loss.shape == () and bool(jnp.isfinite(loss))

    print("KERNEL_OK")
</pallas_src>

<mosaic_0001>
module attributes {stable_mosaic.version = 11 : i64} {
  func.func @mlp_kernel(%arg0: i32, %arg1: memref<8x8xi32, #tpu.memory_space<vmem>>, %arg2: memref<8x128x128xbf16, #tpu.memory_space<vmem>>, %arg3: memref<1x128xf32, #tpu.memory_space<vmem>>, %arg4: memref<128x128xbf16, #tpu.memory_space<vmem>>, %arg5: memref<1x128xf32, #tpu.memory_space<vmem>>, %arg6: memref<8x128xf32, #tpu.memory_space<vmem>>) attributes {dimension_semantics = [#tpu.dimension_semantics<parallel>], iteration_bounds = array<i64: 2>, scalar_prefetch = 0 : i64, scratch_operands = 0 : i64, tpu.core_type = #tpu.core_type<tc>, window_params = [{transform_indices = @transform_0, window_bounds = array<i64: 8, 8>}, {pipeline_mode = #tpu.pipeline_mode<synchronous>, transform_indices = @transform_1, window_bounds = array<i64: 8, 128, 128>}, {pipeline_mode = #tpu.pipeline_mode<synchronous>, transform_indices = @transform_2, window_bounds = array<i64: 1, 128>}, {pipeline_mode = #tpu.pipeline_mode<synchronous>, transform_indices = @transform_3, window_bounds = array<i64: 128, 128>}, {pipeline_mode = #tpu.pipeline_mode<synchronous>, transform_indices = @transform_4, window_bounds = array<i64: 1, 128>}, {transform_indices = @transform_5, window_bounds = array<i64: 8, 128>}]} {
    %c0 = arith.constant 0 : index
    %c0_0 = arith.constant 0 : index
    %0 = vector.load %arg1[%c0, %c0_0] : memref<8x8xi32, #tpu.memory_space<vmem>>, vector<8x8xi32>
    %1 = tpu.iota {dimensions = array<i32: 1>} : vector<1x128xi32>
    %cst = arith.constant 0.000000e+00 : f32
    %2 = vector.broadcast %cst : f32 to vector<8x128xf32>
    %3 = vector.extract_strided_slice %0 {offsets = [0, 0], sizes = [8, 1], strides = [1, 1]} : vector<8x8xi32> to vector<8x1xi32>
    %4 = vector.broadcast %3 : vector<8x1xi32> to vector<8x128xi32>
    %5 = vector.broadcast %1 : vector<1x128xi32> to vector<8x128xi32>
    %6 = arith.cmpi eq, %4, %5 : vector<8x128xi32>
    %cst_1 = arith.constant 1.000000e+00 : f32
    %cst_2 = arith.constant 0.000000e+00 : f32
    %7 = vector.broadcast %cst_1 : f32 to vector<8x128xf32>
    %8 = vector.broadcast %cst_2 : f32 to vector<8x128xf32>
    %9 = arith.select %6, %7, %8 : vector<8x128xi1>, vector<8x128xf32>
    %10 = arith.truncf %9 : vector<8x128xf32> to vector<8x128xbf16>
    %c0_3 = arith.constant 0 : index
    %c0_4 = arith.constant 0 : index
    %c0_5 = arith.constant 0 : index
    %11 = vector.load %arg2[%c0_3, %c0_4, %c0_5] : memref<8x128x128xbf16, #tpu.memory_space<vmem>>, vector<1x128x128xbf16>
    %12 = vector.shape_cast %11 : vector<1x128x128xbf16> to vector<128x128xbf16>
    %cst_6 = arith.constant dense<0.000000e+00> : vector<8x128xf32>
    %13 = tpu.matmul %10, %12, %cst_6 {dimension_numbers = #tpu.dot_dimension_numbers<[1], [0], [0], [1], [0, 0, 1, 1], [], []>} : vector<8x128xbf16>, vector<128x128xbf16>, vector<8x128xf32> -> vector<8x128xf32>
    %14 = arith.addf %2, %13 : vector<8x128xf32>
    %15 = vector.extract_strided_slice %0 {offsets = [0, 1], sizes = [8, 1], strides = [1, 1]} : vector<8x8xi32> to vector<8x1xi32>
    %16 = vector.broadcast %15 : vector<8x1xi32> to vector<8x128xi32>
    %17 = vector.broadcast %1 : vector<1x128xi32> to vector<8x128xi32>
    %18 = arith.cmpi eq, %16, %17 : vector<8x128xi32>
    %cst_7 = arith.constant 1.000000e+00 : f32
    %cst_8 = arith.constant 0.000000e+00 : f32
    %19 = vector.broadcast %cst_7 : f32 to vector<8x128xf32>
    %20 = vector.broadcast %cst_8 : f32 to vector<8x128xf32>
    %21 = arith.select %18, %19, %20 : vector<8x128xi1>, vector<8x128xf32>
    %22 = arith.truncf %21 : vector<8x128xf32> to vector<8x128xbf16>
    %c1 = arith.constant 1 : index
    %c0_9 = arith.constant 0 : index
    %c0_10 = arith.constant 0 : index
    %23 = vector.load %arg2[%c1, %c0_9, %c0_10] : memref<8x128x128xbf16, #tpu.memory_space<vmem>>, vector<1x128x128xbf16>
    %24 = vector.shape_cast %23 : vector<1x128x128xbf16> to vector<128x128xbf16>
    %cst_11 = arith.constant dense<0.000000e+00> : vector<8x128xf32>
    %25 = tpu.matmul %22, %24, %cst_11 {dimension_numbers = #tpu.dot_dimension_numbers<[1], [0], [0], [1], [0, 0, 1, 1], [], []>} : vector<8x128xbf16>, vector<128x128xbf16>, vector<8x128xf32> -> vector<8x128xf32>
    %26 = arith.addf %14, %25 : vector<8x128xf32>
    %27 = vector.extract_strided_slice %0 {offsets = [0, 2], sizes = [8, 1], strides = [1, 1]} : vector<8x8xi32> to vector<8x1xi32>
    %28 = vector.broadcast %27 : vector<8x1xi32> to vector<8x128xi32>
    %29 = vector.broadcast %1 : vector<1x128xi32> to vector<8x128xi32>
    %30 = arith.cmpi eq, %28, %29 : vector<8x128xi32>
    %cst_12 = arith.constant 1.000000e+00 : f32
    %cst_13 = arith.constant 0.000000e+00 : f32
    %31 = vector.broadcast %cst_12 : f32 to vector<8x128xf32>
    %32 = vector.broadcast %cst_13 : f32 to vector<8x128xf32>
    %33 = arith.select %30, %31, %32 : vector<8x128xi1>, vector<8x128xf32>
    %34 = arith.truncf %33 : vector<8x128xf32> to vector<8x128xbf16>
    %c2 = arith.constant 2 : index
    %c0_14 = arith.constant 0 : index
    %c0_15 = arith.constant 0 : index
    %35 = vector.load %arg2[%c2, %c0_14, %c0_15] : memref<8x128x128xbf16, #tpu.memory_space<vmem>>, vector<1x128x128xbf16>
    %36 = vector.shape_cast %35 : vector<1x128x128xbf16> to vector<128x128xbf16>
    %cst_16 = arith.constant dense<0.000000e+00> : vector<8x128xf32>
    %37 = tpu.matmul %34, %36, %cst_16 {dimension_numbers = #tpu.dot_dimension_numbers<[1], [0], [0], [1], [0, 0, 1, 1], [], []>} : vector<8x128xbf16>, vector<128x128xbf16>, vector<8x128xf32> -> vector<8x128xf32>
    %38 = arith.addf %26, %37 : vector<8x128xf32>
    %39 = vector.extract_strided_slice %0 {offsets = [0, 3], sizes = [8, 1], strides = [1, 1]} : vector<8x8xi32> to vector<8x1xi32>
    %40 = vector.broadcast %39 : vector<8x1xi32> to vector<8x128xi32>
    %41 = vector.broadcast %1 : vector<1x128xi32> to vector<8x128xi32>
    %42 = arith.cmpi eq, %40, %41 : vector<8x128xi32>
    %cst_17 = arith.constant 1.000000e+00 : f32
    %cst_18 = arith.constant 0.000000e+00 : f32
    %43 = vector.broadcast %cst_17 : f32 to vector<8x128xf32>
    %44 = vector.broadcast %cst_18 : f32 to vector<8x128xf32>
    %45 = arith.select %42, %43, %44 : vector<8x128xi1>, vector<8x128xf32>
    %46 = arith.truncf %45 : vector<8x128xf32> to vector<8x128xbf16>
    %c3 = arith.constant 3 : index
    %c0_19 = arith.constant 0 : index
    %c0_20 = arith.constant 0 : index
    %47 = vector.load %arg2[%c3, %c0_19, %c0_20] : memref<8x128x128xbf16, #tpu.memory_space<vmem>>, vector<1x128x128xbf16>
    %48 = vector.shape_cast %47 : vector<1x128x128xbf16> to vector<128x128xbf16>
    %cst_21 = arith.constant dense<0.000000e+00> : vector<8x128xf32>
    %49 = tpu.matmul %46, %48, %cst_21 {dimension_numbers = #tpu.dot_dimension_numbers<[1], [0], [0], [1], [0, 0, 1, 1], [], []>} : vector<8x128xbf16>, vector<128x128xbf16>, vector<8x128xf32> -> vector<8x128xf32>
    %50 = arith.addf %38, %49 : vector<8x128xf32>
    %51 = vector.extract_strided_slice %0 {offsets = [0, 4], sizes = [8, 1], strides = [1, 1]} : vector<8x8xi32> to vector<8x1xi32>
    %52 = vector.broadcast %51 : vector<8x1xi32> to vector<8x128xi32>
    %53 = vector.broadcast %1 : vector<1x128xi32> to vector<8x128xi32>
    %54 = arith.cmpi eq, %52, %53 : vector<8x128xi32>
    %cst_22 = arith.constant 1.000000e+00 : f32
    %cst_23 = arith.constant 0.000000e+00 : f32
    %55 = vector.broadcast %cst_22 : f32 to vector<8x128xf32>
    %56 = vector.broadcast %cst_23 : f32 to vector<8x128xf32>
    %57 = arith.select %54, %55, %56 : vector<8x128xi1>, vector<8x128xf32>
    %58 = arith.truncf %57 : vector<8x128xf32> to vector<8x128xbf16>
    %c4 = arith.constant 4 : index
    %c0_24 = arith.constant 0 : index
    %c0_25 = arith.constant 0 : index
    %59 = vector.load %arg2[%c4, %c0_24, %c0_25] : memref<8x128x128xbf16, #tpu.memory_space<vmem>>, vector<1x128x128xbf16>
    %60 = vector.shape_cast %59 : vector<1x128x128xbf16> to vector<128x128xbf16>
    %cst_26 = arith.constant dense<0.000000e+00> : vector<8x128xf32>
    %61 = tpu.matmul %58, %60, %cst_26 {dimension_numbers = #tpu.dot_dimension_numbers<[1], [0], [0], [1], [0, 0, 1, 1], [], []>} : vector<8x128xbf16>, vector<128x128xbf16>, vector<8x128xf32> -> vector<8x128xf32>
    %62 = arith.addf %50, %61 : vector<8x128xf32>
    %63 = vector.extract_strided_slice %0 {offsets = [0, 5], sizes = [8, 1], strides = [1, 1]} : vector<8x8xi32> to vector<8x1xi32>
    %64 = vector.broadcast %63 : vector<8x1xi32> to vector<8x128xi32>
    %65 = vector.broadcast %1 : vector<1x128xi32> to vector<8x128xi32>
    %66 = arith.cmpi eq, %64, %65 : vector<8x128xi32>
    %cst_27 = arith.constant 1.000000e+00 : f32
    %cst_28 = arith.constant 0.000000e+00 : f32
    %67 = vector.broadcast %cst_27 : f32 to vector<8x128xf32>
    %68 = vector.broadcast %cst_28 : f32 to vector<8x128xf32>
    %69 = arith.select %66, %67, %68 : vector<8x128xi1>, vector<8x128xf32>
    %70 = arith.truncf %69 : vector<8x128xf32> to vector<8x128xbf16>
    %c5 = arith.constant 5 : index
    %c0_29 = arith.constant 0 : index
    %c0_30 = arith.constant 0 : index
    %71 = vector.load %arg2[%c5, %c0_29, %c0_30] : memref<8x128x128xbf16, #tpu.memory_space<vmem>>, vector<1x128x128xbf16>
    %72 = vector.shape_cast %71 : vector<1x128x128xbf16> to vector<128x128xbf16>
    %cst_31 = arith.constant dense<0.000000e+00> : vector<8x128xf32>
    %73 = tpu.matmul %70, %72, %cst_31 {dimension_numbers = #tpu.dot_dimension_numbers<[1], [0], [0], [1], [0, 0, 1, 1], [], []>} : vector<8x128xbf16>, vector<128x128xbf16>, vector<8x128xf32> -> vector<8x128xf32>
    %74 = arith.addf %62, %73 : vector<8x128xf32>
    %75 = vector.extract_strided_slice %0 {offsets = [0, 6], sizes = [8, 1], strides = [1, 1]} : vector<8x8xi32> to vector<8x1xi32>
    %76 = vector.broadcast %75 : vector<8x1xi32> to vector<8x128xi32>
    %77 = vector.broadcast %1 : vector<1x128xi32> to vector<8x128xi32>
    %78 = arith.cmpi eq, %76, %77 : vector<8x128xi32>
    %cst_32 = arith.constant 1.000000e+00 : f32
    %cst_33 = arith.constant 0.000000e+00 : f32
    %79 = vector.broadcast %cst_32 : f32 to vector<8x128xf32>
    %80 = vector.broadcast %cst_33 : f32 to vector<8x128xf32>
    %81 = arith.select %78, %79, %80 : vector<8x128xi1>, vector<8x128xf32>
    %82 = arith.truncf %81 : vector<8x128xf32> to vector<8x128xbf16>
    %c6 = arith.constant 6 : index
    %c0_34 = arith.constant 0 : index
    %c0_35 = arith.constant 0 : index
    %83 = vector.load %arg2[%c6, %c0_34, %c0_35] : memref<8x128x128xbf16, #tpu.memory_space<vmem>>, vector<1x128x128xbf16>
    %84 = vector.shape_cast %83 : vector<1x128x128xbf16> to vector<128x128xbf16>
    %cst_36 = arith.constant dense<0.000000e+00> : vector<8x128xf32>
    %85 = tpu.matmul %82, %84, %cst_36 {dimension_numbers = #tpu.dot_dimension_numbers<[1], [0], [0], [1], [0, 0, 1, 1], [], []>} : vector<8x128xbf16>, vector<128x128xbf16>, vector<8x128xf32> -> vector<8x128xf32>
    %86 = arith.addf %74, %85 : vector<8x128xf32>
    %87 = vector.extract_strided_slice %0 {offsets = [0, 7], sizes = [8, 1], strides = [1, 1]} : vector<8x8xi32> to vector<8x1xi32>
    %88 = vector.broadcast %87 : vector<8x1xi32> to vector<8x128xi32>
    %89 = vector.broadcast %1 : vector<1x128xi32> to vector<8x128xi32>
    %90 = arith.cmpi eq, %88, %89 : vector<8x128xi32>
    %cst_37 = arith.constant 1.000000e+00 : f32
    %cst_38 = arith.constant 0.000000e+00 : f32
    %91 = vector.broadcast %cst_37 : f32 to vector<8x128xf32>
    %92 = vector.broadcast %cst_38 : f32 to vector<8x128xf32>
    %93 = arith.select %90, %91, %92 : vector<8x128xi1>, vector<8x128xf32>
    %94 = arith.truncf %93 : vector<8x128xf32> to vector<8x128xbf16>
    %c7 = arith.constant 7 : index
    %c0_39 = arith.constant 0 : index
    %c0_40 = arith.constant 0 : index
    %95 = vector.load %arg2[%c7, %c0_39, %c0_40] : memref<8x128x128xbf16, #tpu.memory_space<vmem>>, vector<1x128x128xbf16>
    %96 = vector.shape_cast %95 : vector<1x128x128xbf16> to vector<128x128xbf16>
    %cst_41 = arith.constant dense<0.000000e+00> : vector<8x128xf32>
    %97 = tpu.matmul %94, %96, %cst_41 {dimension_numbers = #tpu.dot_dimension_numbers<[1], [0], [0], [1], [0, 0, 1, 1], [], []>} : vector<8x128xbf16>, vector<128x128xbf16>, vector<8x128xf32> -> vector<8x128xf32>
    %98 = arith.addf %86, %97 : vector<8x128xf32>
    %c0_42 = arith.constant 0 : index
    %c0_43 = arith.constant 0 : index
    %99 = vector.load %arg3[%c0_42, %c0_43] : memref<1x128xf32, #tpu.memory_space<vmem>>, vector<1x128xf32>
    %100 = vector.broadcast %99 : vector<1x128xf32> to vector<8x128xf32>
    %101 = arith.addf %98, %100 : vector<8x128xf32>
    %102 = math.tanh %101 : vector<8x128xf32>
    %103 = arith.truncf %102 : vector<8x128xf32> to vector<8x128xbf16>
    %c0_44 = arith.constant 0 : index
    %c0_45 = arith.constant 0 : index
    %104 = vector.load %arg4[%c0_44, %c0_45] : memref<128x128xbf16, #tpu.memory_space<vmem>>, vector<128x128xbf16>
    %cst_46 = arith.constant dense<0.000000e+00> : vector<8x128xf32>
    %105 = tpu.matmul %103, %104, %cst_46 {dimension_numbers = #tpu.dot_dimension_numbers<[1], [0], [0], [1], [0, 0, 1, 1], [], []>} : vector<8x128xbf16>, vector<128x128xbf16>, vector<8x128xf32> -> vector<8x128xf32>
    %c0_47 = arith.constant 0 : index
    %c0_48 = arith.constant 0 : index
    %106 = vector.load %arg5[%c0_47, %c0_48] : memref<1x128xf32, #tpu.memory_space<vmem>>, vector<1x128xf32>
    %107 = vector.broadcast %106 : vector<1x128xf32> to vector<8x128xf32>
    %108 = arith.addf %105, %107 : vector<8x128xf32>
    %c0_49 = arith.constant 0 : index
    %c0_50 = arith.constant 0 : index
    %109 = vector.load %arg6[%c0_49, %c0_50] : memref<8x128xf32, #tpu.memory_space<vmem>>, vector<8x128xf32>
    tpu.vector_store %arg6[%c0_49, %c0_50], %108 {strides = array<i32>} : memref<8x128xf32, #tpu.memory_space<vmem>>, vector<8x128xf32>,
    return
  }
  func.func @transform_0(%arg0: i32) -> (i32, i32) {
    %c0_i32 = arith.constant 0 : i32
    %c0_i32_0 = arith.constant 0 : i32
    return %arg0, %c0_i32 : i32, i32
  }
  func.func @transform_1(%arg0: i32) -> (i32, i32, i32) {
    %c0_i32 = arith.constant 0 : i32
    %c0_i32_0 = arith.constant 0 : i32
    %c0_i32_1 = arith.constant 0 : i32
    %c0_i32_2 = arith.constant 0 : i32
    return %c0_i32, %c0_i32_0, %c0_i32_1 : i32, i32, i32
  }
  func.func @transform_2(%arg0: i32) -> (i32, i32) {
    %c0_i32 = arith.constant 0 : i32
    %c0_i32_0 = arith.constant 0 : i32
    %c0_i32_1 = arith.constant 0 : i32
    return %c0_i32, %c0_i32_0 : i32, i32
  }
  func.func @transform_3(%arg0: i32) -> (i32, i32) {
    %c0_i32 = arith.constant 0 : i32
    %c0_i32_0 = arith.constant 0 : i32
    %c0_i32_1 = arith.constant 0 : i32
    return %c0_i32, %c0_i32_0 : i32, i32
  }
  func.func @transform_4(%arg0: i32) -> (i32, i32) {
    %c0_i32 = arith.constant 0 : i32
    %c0_i32_0 = arith.constant 0 : i32
    %c0_i32_1 = arith.constant 0 : i32
    return %c0_i32, %c0_i32_0 : i32, i32
  }
  func.func @transform_5(%arg0: i32) -> (i32, i32) {
    %c0_i32 = arith.constant 0 : i32
    %c0_i32_0 = arith.constant 0 : i32
    return %arg0, %c0_i32 : i32, i32
  }
}

</mosaic_0001>

<bundles_post_ra>
// kernel: tpu_custom_call.1
= control target key start
LH: loop header
LB: loop body
LE: loop exit
PB: predicated region body
PF: predicated region fallthrough
CT: control target
= control target key end

     0   :  { %10 = vsyncpa [#allocation3], 0  ;;  %s2345_s0 = inlined_call_operand.vmem [shape: s32[16,8], index: 0, kind: input, shape index: {}]   ;;  %s2346_s1 = inlined_call_operand.hbm [shape: bf16[8,128,128], index: 1, kind: input, shape index: {}]   ;;  %s2347_s2 = inlined_call_operand.vmem [shape: f32[1,128], index: 2, kind: input, shape index: {}]   ;;  %s2348_s3 = inlined_call_operand.hbm [shape: bf16[128,128], index: 3, kind: input, shape index: {}]   ;;  %s2349_s4 = inlined_call_operand.vmem [shape: f32[1,128], index: 4, kind: input, shape index: {}]   ;;  %s2350_s5 = inlined_call_operand.hbm [shape: f32[16,128], index: 5, kind: output, shape index: {}]  }
   0x1   :  { %11 = vsyncpa [#allocation6], 0 }
   0x2   :  { %12 = vsyncpa [#allocation4], 0 }
   0x3   :  { %14 = vsyncpa [#allocation4 + $0x1], 0  ;;  %s2059_s18 = smov 0   ;;  %s2061_s19 = smov 0  }
   0x4   :  { %s2063_s20 = smov 0   ;;  %s2065_s21 = smov 0  }
   0x5 LB: > { %s2080_s22 = sadd.s32 4294967295, %s2011_s21   ;;  %s1364_s23 = sadd.s32 4294967294, %s2011_s21   ;;  %s2011_s21 = sphi %s2065_s21, %s2368_s21   ;;  %s2007_s20 = sphi %s2063_s20, %s2367_s20   ;;  %s2003_s19 = sphi %s2061_s19, %s2366_s19   ;;  %s1999_s18 = sphi %s2059_s18, %s2365_s18  }
   0x6   : > { %s2084_s24 = sadd.s32 1, %s2011_s21   ;;  %s137_s25 = sadd.s32 1, %s2007_s20 }
   0x7   : > { %s134_s26 = ssub.s32 %s2011_s21, %s2084_s24  ;;  %p147_p0 = scmp.ne.s32.totalorder %s2007_s20, %s2003_s19 }
   0x8   : > { %p135_p1 = scmp.eq.s32.totalorder %s134_s26, 0  ;;  %p148_p2 = scmp.eq.s32.totalorder %s2080_s22, 1 }
   0x9   : > { %p153_p3 = scmp.ne.s32.totalorder %s2003_s19, %s1999_s18  ;;  %p154_p4 = scmp.eq.s32.totalorder %s1364_s23, 1 }
   0xa   : > { %s2095_s27 = scalar_select %p135_p1, %s2007_s20, %s137_s25  }
   0xb   : > { %p2097_p5 = por %p148_p2, %p147_p0  ;;  %p2101_p6 = por %p154_p4, %p153_p3 }
   0xc   : > { %p1365_p7 = scmp.ge.s32.totalorder %s2011_s21, 1  ;;  %p161_p8 = scmp.lt.s32.totalorder %s2011_s21, 3 }
   0xd   : > { %s2354_s28 = scalar_select %p2097_p5, 1, 0 }
   0xe   : > { %s2355_s29 = scalar_select %p2101_p6, 1, 0 }
   0xf   : > { %p2351_p9 = scmp.eq.s32.totalorder %s2080_s22, 0  ;;  %p2108_p10 = pnand %p1365_p7, %p161_p8 }
  0x10   : > { %s2013_s6 = smov [#allocation2]   ;;  %s2014_s9 = smov [#allocation5]  }
  0x11   : > { %s2356_s30 = scalar_select %p2108_p10, 1, 0 }
  0x12   : > { %s173_s7 = sshll.u32 %s2013_s6, 4  ;;  %p1739_p11 = pneg %p2108_p10  ;;  %s174_s7 = int_to_ptr.vmem [resolvable:$true] %s173_s7 }
  0x13   : > { %s189_s10 = sshll.u32 %s2014_s9, 4  ;;  %s1885_s13 = scalar_lea.hbm %s2346_s1, 8192  ;;  %s2120_s10 = int_to_ptr.vmem [resolvable:$true] %s189_s10 }
  0x14   : > { %p2116_p12 = pnand %p2351_p9, %p1739_p11  ;;  %p1886_p13 = scmp.ne.s32.totalorder %s2346_s1, %s1885_s13 }
  0x15   : > { %p1892_p3 = scmp.lt.u32.totalorder %s1885_s13, %s2346_s1 }
  0x16   : > { %p1887_p0 = pneg %p2116_p12 }
  0x18   : > { %p1888_p1 = pnand %p1887_p0, %p1886_p13 }
  0x1a   : > { %p1889_p2 = pneg %p1888_p1 }
  0x1c   : > { %p1894_p4 = pnand %p1892_p3, %p1889_p2 }
  0x1e   : > { %1897 = shalt.err (!%p1894_p4)
}
  0x1f   : > { %s1898_s23 = scalar_lea.vmem %s174_s7, 8192  ;;  %p1906_p9 = scmp.lt.s32.totalorder %s174_s7, %s174_s7 }
  0x20   : > { %p1899_p7 = scmp.ne.s32.totalorder %s174_s7, %s1898_s23  ;;  %p1907_p6 = scmp.lt.s32.totalorder %s1898_s23, %s1898_s23 }
  0x22   : > { %p1901_p8 = pnand %p1899_p7, %p1887_p0  ;;  %p1908_p5 = por %p1907_p6, %p1906_p9 }
  0x24   : > { %p1902_p11 = pneg %p1901_p8 }
  0x26   : > { %p1909_p10 = pnand %p1908_p5, %p1902_p11 }
  0x28   : > { %1912 = shalt.err (!%p1909_p10)
}
  0x29   : > { %s2015_s25 = smov 64   ;;  %s2016_s26 = smov 4  }
  0x2a   : > { %1742 = dma.hbm_to_vmem [thread:$0]  (!%p2116_p12), %s2346_s1, 8192, %s174_s7, [#allocation3], %s2015_s25, %s2015_s25, %s2016_s26  }
  0x2b   : > { %s1913_s13 = scalar_lea.hbm %s2348_s3, 1024 }
  0x2c   : > { %p1914_p13 = scmp.ne.s32.totalorder %s2348_s3, %s1913_s13  ;;  %p1920_p9 = scmp.lt.u32.totalorder %s1913_s13, %s2348_s3 }
  0x2e   : > { %p1916_p5 = pnand %p1914_p13, %p1887_p0 }
  0x30   : > { %p1917_p6 = pneg %p1916_p5 }
  0x32   : > { %p1922_p10 = pnand %p1920_p9, %p1917_p6 }
  0x34   : > { %1925 = shalt.err (!%p1922_p10)
}
  0x35   : > { %s1926_s7 = scalar_lea.vmem %s2120_s10, 1024  ;;  %p1934_p4 = scmp.lt.s32.totalorder %s2120_s10, %s2120_s10 }
  0x36   : > { %p1927_p1 = scmp.ne.s32.totalorder %s2120_s10, %s1926_s7  ;;  %p1935_p7 = scmp.lt.s32.totalorder %s1926_s7, %s1926_s7 }
  0x38   : > { %p1929_p2 = pnand %p1927_p1, %p1887_p0  ;;  %p1936_p8 = por %p1935_p7, %p1934_p4 }
  0x3a   : > { %p1930_p3 = pneg %p1929_p2 }
  0x3c   : > { %p1937_p11 = pnand %p1936_p8, %p1930_p3 }
  0x3e   : > { %1940 = shalt.err (!%p1937_p11)
}
  0x3f   : > { %1745 = dma.hbm_to_vmem [thread:$0]  (!%p2116_p12), %s2348_s3, 1024, %s2120_s10, [#allocation6], %s2015_s25, %s2015_s25, %s2016_s26  }
  0x40   : > { %p2358_p13 = scmp.ne.s32.totalorder %s2356_s30, 0 }
  0x41   : > { %p2359_p5 = scmp.eq.s32.totalorder (!%p2358_p13), %s2080_s22, 0 }
  0x42   : > { %215 = sbr.rel (%p2358_p13) target bundleno = 773 (0x305), region = 40 }
  0x49   : > { %1986 = dma.done.wait (%p2359_p5), [#allocation3], 8192   ;;  %p2360_p0 = pmov %p2359_p5 }
  0x4b   : > { %1988 = vsyncadd (%p2360_p0), [#allocation3], 4294959104  ;;  %p2361_p6 = pmov %p2360_p0 }
  0x4c   : > { %p2362_p9 = pmov %p2360_p0 }
  0x4d   : > { %1990 = dma.done.wait (%p2361_p6), [#allocation6], 1024  }
  0x4e   : > { %1992 = vsyncadd (%p2362_p9), [#allocation6], 4294966272  ;;  %p246_p10 = scmp.lt.s32.totalorder %s2080_s22, 1  ;;  %v2017_v0 = vmov 1   ;;  %v2018_v1 = vmov 2   ;;  %v2019_v2 = vmov 0.0   ;;  %v252_v26 = vlaneseq }
  0x4f   : > { %1802 = vset.pattern.permute.xlu0 %v2017_v0  ;;  %1804 = vset.pattern.permute.xlu1 %v2018_v1  ;;  %v1811_v4 = vld [vmem:[#allocation2 + $0x40] sm:$0xff]   ;;  %v1812_v5 = vld [vmem:[#allocation2 + $0x48] sm:$0xff]   ;;  %vm2020_vm0 = vmmov 0   ;;  %v2021_v7 = vmov 0   ;;  %v2022_v8 = vmov 3   ;;  %v1814_v9 = vld [vmem:[#allocation2 + $0x50] sm:$0xff]  }
  0x50   : > { %s247_s30 = scalar_select %p246_p10, %s2080_s22, 1  ;;  %1549 = vmatprep.subr.bf16.mxu0 %v2019_v2  ;;  %1569 = vmatprep.subr.bf16.mxu1 %v2019_v2  ;;  %v1813_v6 = vld [vmem:[#allocation2] sm:$0xff]   ;;  %v1815_v10 = vld [vmem:[#allocation2 + $0x8] sm:$0xff]   ;;  %v2023_v11 = vmov 4   ;;  %v2024_v12 = vmov 5   ;;  %v1816_v13 = vld [vmem:[#allocation2 + $0x58] sm:$0xff]  }
  0x51   : > { %1565 = vmatprep.mubr.msk.bf16.mxu0 %vm2020_vm0, %v2019_v2  ;;  %1585 = vmatprep.mubr.msk.bf16.mxu1 %vm2020_vm0, %v2019_v2  ;;  %v1817_v14 = vld [vmem:[#allocation2 + $0x10] sm:$0xff]   ;;  %v2025_v15 = vmov 6   ;;  %v1818_v16 = vld [vmem:[#allocation2 + $0x60] sm:$0xff]   ;;  %v2026_v17 = vmov 7   ;;  %v1819_v18 = vld [vmem:[#allocation2 + $0x18] sm:$0xff]   ;;  %v2206_v27 = vand.u32 127, %v252_v26 }
  0x52   : > { %s1373_s8 = sshll.u32 %s247_s30, 3  ;;  %1550 = vmatpush3.bf16.msra.mxu0 %v1811_v4  ;;  %1570 = vmatpush3.bf16.msra.mxu1 %v1813_v6  ;;  %v1820_v19 = vld [vmem:[#allocation2 + $0x68] sm:$0xff]   ;;  %v1821_v20 = vld [vmem:[#allocation2 + $0x20] sm:$0xff]   ;;  %v1822_v21 = vld [vmem:[#allocation2 + $0x70] sm:$0xff]   ;;  %v2027_v30 = vmov 1.0|1.0  }
  0x53   : > { %s249_s26 = scalar_lea.vmem %s2345_s0, %s1373_s8  ;;  %1551 = vmatprep.subr.bf16.mxu0 %v2019_v2  ;;  %1571 = vmatprep.subr.bf16.mxu1 %v2019_v2  ;;  %v1823_v22 = vld [vmem:[#allocation2 + $0x28] sm:$0xff]   ;;  %v1824_v23 = vld [vmem:[#allocation2 + $0x78] sm:$0xff]   ;;  %v1825_v24 = vld [vmem:[#allocation2 + $0x30] sm:$0xff]   ;;  %s243_s12 = sand.u32 1, %s2003_s19  }
  0x54   : > { %v251_v3 = vld [vmem:[%s249_s26] sm:$0xff]  ;;  %v1827_v25 = vld [vmem:[#allocation2 + $0x38] sm:$0xff]   ;;  %v1828_v31 = vld [vmem:[#allocation2 + $0x88] sm:$0xff]   ;;  %s1372_s13 = sshll.u32 %s243_s12, 3  ;;  %s1465_s16 = sshll.u32 %s2080_s22, 7 }
  0x55   : > { %277 = vperm.xlu0 %1802, %v251_v3   ;;  %476 = vperm.xlu1 %1804, %v251_v3   ;;  %v1826_v29 = vld [vmem:[#allocation2 + $0x80] sm:$0xff]   ;;  %v1830_v34 = vld [vmem:[#allocation2 + $0x90] sm:$0xff]   ;;  %v1831_v35 = vld [vmem:[#allocation2 + $0xc8] sm:$0xff]   ;;  %s245_s17 = scalar_lea.vmem [#allocation7], %s1372_s13  ;;  %s2303_s30 = scalar_lea.hbm %s2350_s5, %s1465_s16 }
  0x56   : > { %1552 = vmatpush3.bf16.msra.mxu0 %v1812_v5  ;;  %1572 = vmatpush3.bf16.msra.mxu1 %v1815_v10  ;;  %v1829_v33 = vld [vmem:[#allocation2 + $0xc0] sm:$0xff]   ;;  %v1832_v36 = vld [vmem:[#allocation2 + $0x98] sm:$0xff]   ;;  %v1833_v37 = vld [vmem:[#allocation2 + $0xd0] sm:$0xff]   ;;  %s1283_s7 = sshll.u32 %s245_s17, 4  ;;  %s1270_s8 = scalar_lea.sflag [#allocation4], %s243_s12  ;;  %s2305_s7 = int_to_ptr.vmem [resolvable:$true] %s1283_s7 }
  0x57   : > { %1553 = vmatprep.subr.bf16.mxu0 %v2019_v2  ;;  %1573 = vmatprep.subr.bf16.mxu1 %v2019_v2  ;;  %v1834_v38 = vld [vmem:[#allocation2 + $0xa0] sm:$0xff]   ;;  %v1835_v39 = vld [vmem:[#allocation2 + $0xd8] sm:$0xff]   ;;  %v1836_v40 = vld [vmem:[#allocation2 + $0xa8] sm:$0xff]   ;;  %s1941_s22 = scalar_lea.vmem %s2305_s7, 128  ;;  %p2363_p1 = scmp.ne.s32.totalorder %s2354_s28, 0 }
  0x58   : > { %v1837_v41 = vld [vmem:[#allocation2 + $0xe0] sm:$0xff]   ;;  %v1838_v42 = vld [vmem:[#allocation2 + $0xb0] sm:$0xff]   ;;  %v1839_v43 = vld [vmem:[#allocation2 + $0xe8] sm:$0xff]   ;;  %p1942_p12 = scmp.ne.s32.totalorder %s2305_s7, %s1941_s22  ;;  %s2028_s10 = smov [#allocation7]  }
  0x59   : > { %1803 = vset.pattern.permute.xlu0 %v2021_v7  ;;  %1805 = vset.pattern.permute.xlu1 %v2022_v8  ;;  %v1840_v45 = vld [vmem:[#allocation2 + $0xb8] sm:$0xff]   ;;  %v1841_v46 = vld [vmem:[#allocation2 + $0xf0] sm:$0xff]   ;;  %v1842_v48 = vld [vmem:[#allocation2 + $0x100] sm:$0xff]   ;;  %s1945_s25 = sshll.u32 %s2028_s10, 4  ;;  %s1946_s25 = int_to_ptr.vmem [resolvable:$false] %s1945_s25 }
  0x5a   : > { %255 = vperm.xlu0 %1803, %v251_v3   ;;  %588 = vperm.xlu1 %1805, %v251_v3   ;;  %v1843_v49 = vld [vmem:[#allocation2 + $0xf8] sm:$0xff]   ;;  %v1844_v50 = vld [vmem:[#allocation2 + $0x108] sm:$0xff]   ;;  %v1845_v51 = vld [vmem:[#allocation2 + $0x140] sm:$0xff]   ;;  %p1943_p2 = pnand %p1942_p12, %p2363_p1  ;;  %s1947_s26 = scalar_lea.vmem %s1946_s25, 256 }
  0x5b   : > { %1554 = vmatpush3.bf16.msra.mxu0 %v1814_v9  ;;  %1574 = vmatpush3.bf16.msra.mxu1 %v1817_v14  ;;  %v1846_v52 = vld [vmem:[#allocation2 + $0x110] sm:$0xff]   ;;  %v1847_v53 = vld [vmem:[#allocation2 + $0x148] sm:$0xff]   ;;  %v1848_v54 = vld [vmem:[#allocation2 + $0x118] sm:$0xff]   ;;  %p1948_p4 = scmp.lt.s32.totalorder %s2305_s7, %s1946_s25  ;;  %p1949_p7 = scmp.lt.s32.totalorder %s1947_s26, %s1941_s22 }
  0x5c   : > { %1555 = vmatprep.subr.bf16.mxu0 %v2019_v2  ;;  %1575 = vmatprep.subr.bf16.mxu1 %v2019_v2  ;;  %v1849_v55 = vld [vmem:[#allocation2 + $0x150] sm:$0xff]   ;;  %v1850_v56 = vld [vmem:[#allocation2 + $0x120] sm:$0xff]   ;;  %v1851_v57 = vld [vmem:[#allocation2 + $0x158] sm:$0xff]   ;;  %p1944_p3 = pneg %p1943_p2 }
  0x5d   : > { %v1852_v58 = vld [vmem:[#allocation2 + $0x128] sm:$0xff]   ;;  %v1853_v59 = vld [vmem:[#allocation2 + $0x160] sm:$0xff]   ;;  %v1854_v60 = vld [vmem:[#allocation2 + $0x130] sm:$0xff]   ;;  %p1950_p8 = por %p1949_p7, %p1948_p4 }
  0x5e   : > { %1806 = vset.pattern.permute.xlu1 %v2023_v11  ;;  %1807 = vset.pattern.permute.xlu0 %v2024_v12  ;;  %v1855_v61 = vld [vmem:[#allocation2 + $0x168] sm:$0xff]   ;;  %v1856_v63 = vld [vmem:[#allocation2 + $0x138] sm:$0xff]   ;;  %v1857_v0 = vld [vmem:[#allocation2 + $0x170] sm:$0xff]  }
  0x5f   : > { %700 = vperm.xlu1 %1806, %v251_v3   ;;  %812 = vperm.xlu0 %1807, %v251_v3   ;;  %v1859_v4 = vld [vmem:[#allocation2 + $0x178] sm:$0xff]   ;;  %v1860_v5 = vld [vmem:[#allocation2 + $0x188] sm:$0xff]   ;;  %v1861_v6 = vld [vmem:[#allocation2 + $0x1c0] sm:$0xff]   ;;  %p1951_p11 = pnand %p1950_p8, %p1944_p3 }
  0x60   : > { %1556 = vmatpush3.bf16.msra.mxu0 %v1816_v13  ;;  %1576 = vmatpush3.bf16.msra.mxu1 %v1819_v18  ;;  %v1862_v7 = vld [vmem:[#allocation2 + $0x190] sm:$0xff]   ;;  %v1863_v8 = vld [vmem:[#allocation2 + $0x1c8] sm:$0xff]   ;;  %v1864_v9 = vld [vmem:[#allocation2 + $0x198] sm:$0xff]  }
  0x61   : > { %1557 = vmatprep.subr.bf16.mxu0 %v2019_v2  ;;  %1577 = vmatprep.subr.bf16.mxu1 %v2019_v2  ;;  %v1865_v10 = vld [vmem:[#allocation2 + $0x1d0] sm:$0xff]   ;;  %v1866_v11 = vld [vmem:[#allocation2 + $0x1a0] sm:$0xff]   ;;  %v1867_v12 = vld [vmem:[#allocation2 + $0x1d8] sm:$0xff]  }
  0x62   : > { %v1868_v13 = vld [vmem:[#allocation2 + $0x1a8] sm:$0xff]   ;;  %v1869_v14 = vld [vmem:[#allocation2 + $0x1e0] sm:$0xff]   ;;  %v1872_v18 = vld [vmem:[#allocation2 + $0x1b8] sm:$0xff]  }
  0x63   : > { %1808 = vset.pattern.permute.xlu1 %v2025_v15  ;;  %1810 = vset.pattern.permute.xlu0 %v2026_v17  ;;  %v1870_v15 = vld [vmem:[#allocation2 + $0x1b0] sm:$0xff]   ;;  %v1879_v26 = vld [vmem:[#allocation5 + $0x20] sm:$0xff]  }
  0x64   : > { %924 = vperm.xlu1 %1808, %v251_v3   ;;  %1558 = vmatpush3.bf16.msra.mxu0 %v1818_v16  ;;  %v1871_v16 = vld [vmem:[#allocation2 + $0x1e8] sm:$0xff]  }
  0x65   : > { %1559 = vmatprep.subr.bf16.mxu0 %v2019_v2  ;;  %1578 = vmatpush3.bf16.msra.mxu1 %v1821_v20 }
  0x66   : > { %1579 = vmatprep.subr.bf16.mxu1 %v2019_v2 }
  0x68   : > { %1809 = vset.pattern.permute.xlu1 %v2026_v17  ;;  %1560 = vmatpush3.bf16.msra.mxu0 %v1820_v19  ;;  %v1873_v19 = vld [vmem:[#allocation2 + $0x1f0] sm:$0xff]  }
  0x69   : > { %1036 = vperm.xlu1 %1809, %v251_v3   ;;  %1561 = vmatprep.subr.bf16.mxu0 %v2019_v2  ;;  %v1858_v3 = vld [vmem:[#allocation2 + $0x180] sm:$0xff]  }
  0x6a   : > { %1580 = vmatpush3.bf16.msra.mxu1 %v1823_v22  ;;  %v1875_v22 = vld [vmem:[#allocation5] sm:$0xff]  }
  0x6b   : > { %1581 = vmatprep.subr.bf16.mxu1 %v2019_v2 }
  0x6c   : > { %1562 = vmatpush3.bf16.msra.mxu0 %v1822_v21  ;;  %v1874_v21 = vld [vmem:[#allocation2 + $0x1f8] sm:$0xff]  }
  0x6d   : > { %1563 = vmatprep.subr.bf16.mxu0 %v2019_v2 }
  0x6e   : > { %1582 = vmatpush3.bf16.msra.mxu1 %v1825_v24  ;;  %v1877_v24 = vld [vmem:[#allocation5 + $0x10] sm:$0xff]  }
  0x6f   : > { %1583 = vmatprep.subr.bf16.mxu1 %v2019_v2 }
  0x70   : > { %1564 = vmatpush3.bf16.msra.mxu0 %v1824_v23  ;;  %v1876_v23 = vld [vmem:[#allocation5 + $0x8] sm:$0xff]  }
  0x71   : > { %1589 = vmatprep.subr.bf16.mxu0 %v2019_v2 }
  0x72   : > { %1584 = vmatpush3.bf16.msra.mxu1 %v1827_v25  ;;  %v1878_v25 = vld [vmem:[#allocation5 + $0x18] sm:$0xff]  }
  0x73   : > { %1609 = vmatprep.subr.bf16.mxu1 %v2019_v2 }
  0xd4   : > { %v278_v28 = vpop.permute.xlu0 %277  ;;  %v477_v44 = vpop.permute.xlu1 %476 }
  0xd5   : > { %vm279_vm1 = vcmp.eq.s32.totalorder %v278_v28, %v2206_v27  ;;  %vm478_vm5 = vcmp.eq.s32.totalorder %v477_v44, %v2206_v27  ;;  %v1881_v28 = vld [vmem:[#allocation5 + $0x30] sm:$0xff]  }
  0xd6   : > { %vm1382_vm2 = vmpackc.low %vm279_vm1, %vm279_vm1 }
  0xd7   : > { %1566 = vmatmul.mubr.msk.bf16.vlgmr.msra.gmra.mrb[0].mxu0 %vm1382_vm2, %v2027_v30  ;;  %vm1402_vm6 = vmpackc.low %vm478_vm5, %vm478_vm5 }
  0xd8   : > { %1590 = vmatpush3.bf16.msra.mxu0 %v1826_v29  ;;  %1605 = vmatprep.mubr.msk.bf16.mxu0 %vm2020_vm0, %v2019_v2  ;;  %v1882_v29 = vld [vmem:[#allocation5 + $0x38] sm:$0xff]  }
  0xd9   : > { %v256_v32 = vpop.permute.xlu0 %255  ;;  %1591 = vmatprep.subr.bf16.mxu0 %v2019_v2  ;;  %v589_v47 = vpop.permute.xlu1 %588 }
  0xda   : > { %vm257_vm3 = vcmp.eq.s32.totalorder %v256_v32, %v2206_v27  ;;  %vm590_vm7 = vcmp.eq.s32.totalorder %v589_v47, %v2206_v27 }
  0xdb   : > { %vm1392_vm4 = vmpackc.low %vm257_vm3, %vm257_vm3 }
  0xdc   : > { %1592 = vmatpush3.bf16.msra.mxu0 %v1828_v31  ;;  %1586 = vmatmul.mubr.msk.bf16.vlgmr.msra.gmra.mrb[0].mxu1 %vm1392_vm4, %v2027_v30  ;;  %vm1412_vm8 = vmpackc.low %vm590_vm7, %vm590_vm7 }
  0xdd   : > { %1610 = vmatpush3.bf16.msra.mxu1 %v1829_v33  ;;  %1593 = vmatprep.subr.bf16.mxu0 %v2019_v2 }
  0xde   : > { %1611 = vmatprep.subr.bf16.mxu1 %v2019_v2  ;;  %1625 = vmatprep.mubr.msk.bf16.mxu1 %vm2020_vm0, %v2019_v2  ;;  %v701_v62 = vpop.permute.xlu1 %700  ;;  %v813_v1 = vpop.permute.xlu0 %812 }
  0xdf   : > { %vm702_vm9 = vcmp.eq.s32.totalorder %v701_v62, %v2206_v27  ;;  %vm814_vm11 = vcmp.eq.s32.totalorder %v813_v1, %v2206_v27 }
  0xe0   : > { %1594 = vmatpush3.bf16.msra.mxu0 %v1830_v34  ;;  %vm1422_vm10 = vmpackc.low %vm702_vm9, %vm702_vm9 }
  0xe1   : > { %1612 = vmatpush3.bf16.msra.mxu1 %v1831_v35  ;;  %1595 = vmatprep.subr.bf16.mxu0 %v2019_v2  ;;  %vm1432_vm12 = vmpackc.low %vm814_vm11, %vm814_vm11 }
  0xe2   : > { %1613 = vmatprep.subr.bf16.mxu1 %v2019_v2 }
  0xe3   : > { %v925_v17 = vpop.permute.xlu1 %924 }
  0xe4   : > { %1596 = vmatpush3.bf16.msra.mxu0 %v1832_v36  ;;  %vm926_vm13 = vcmp.eq.s32.totalorder %v925_v17, %v2206_v27 }
  0xe5   : > { %1614 = vmatpush3.bf16.msra.mxu1 %v1833_v37  ;;  %1597 = vmatprep.subr.bf16.mxu0 %v2019_v2  ;;  %vm1442_vm14 = vmpackc.low %vm926_vm13, %vm926_vm13 }
  0xe6   : > { %1615 = vmatprep.subr.bf16.mxu1 %v2019_v2 }
  0xe8   : > { %1598 = vmatpush3.bf16.msra.mxu0 %v1834_v38  ;;  %v1037_v20 = vpop.permute.xlu1 %1036 }
  0xe9   : > { %1616 = vmatpush3.bf16.msra.mxu1 %v1835_v39  ;;  %1599 = vmatprep.subr.bf16.mxu0 %v2019_v2  ;;  %vm1038_vm15 = vcmp.eq.s32.totalorder %v1037_v20, %v2206_v27  ;;  %v1880_v27 = vld [vmem:[#allocation5 + $0x28] sm:$0xff]  }
  0xea   : > { %1617 = vmatprep.subr.bf16.mxu1 %v2019_v2  ;;  %vm1452_vm1 = vmpackc.low %vm1038_vm15, %vm1038_vm15 }
  0xec   : > { %1600 = vmatpush3.bf16.msra.mxu0 %v1836_v40 }
  0xed   : > { %1618 = vmatpush3.bf16.msra.mxu1 %v1837_v41  ;;  %1601 = vmatprep.subr.bf16.mxu0 %v2019_v2 }
  0xee   : > { %1619 = vmatprep.subr.bf16.mxu1 %v2019_v2 }
  0xf0   : > { %1602 = vmatpush3.bf16.msra.mxu0 %v1838_v42 }
  0xf1   : > { %1620 = vmatpush3.bf16.msra.mxu1 %v1839_v43  ;;  %1603 = vmatprep.subr.bf16.mxu0 %v2019_v2 }
  0xf2   : > { %1621 = vmatprep.subr.bf16.mxu1 %v2019_v2 }
  0xf4   : > { %1604 = vmatpush3.bf16.msra.mxu0 %v1840_v45 }
  0xf5   : > { %1622 = vmatpush3.bf16.msra.mxu1 %v1841_v46  ;;  %1629 = vmatprep.subr.bf16.mxu0 %v2019_v2 }
  0xf6   : > { %1623 = vmatprep.subr.bf16.mxu1 %v2019_v2 }
  0xf7   : > { %1606 = vmatmul.mubr.msk.bf16.vlgmr.msra.gmra.mrb[4].mxu0 %vm1402_vm6, %v2027_v30 }
  0xf8   : > { %1630 = vmatpush3.bf16.msra.mxu0 %v1842_v48  ;;  %1645 = vmatprep.mubr.msk.bf16.mxu0 %vm2020_vm0, %v2019_v2 }
  0xf9   : > { %1624 = vmatpush3.bf16.msra.mxu1 %v1843_v49  ;;  %1631 = vmatprep.subr.bf16.mxu0 %v2019_v2 }
  0xfa   : > { %1649 = vmatprep.subr.bf16.mxu1 %v2019_v2 }
  0xfc   : > { %1626 = vmatmul.mubr.msk.bf16.vlgmr.msra.gmra.mrb[4].mxu1 %vm1412_vm8, %v2027_v30  ;;  %1632 = vmatpush3.bf16.msra.mxu0 %v1844_v50 }
  0xfd   : > { %1650 = vmatpush3.bf16.msra.mxu1 %v1845_v51  ;;  %1633 = vmatprep.subr.bf16.mxu0 %v2019_v2 }
  0xfe   : > { %1651 = vmatprep.subr.bf16.mxu1 %v2019_v2  ;;  %1665 = vmatprep.mubr.msk.bf16.mxu1 %vm2020_vm0, %v2019_v2 }
 0x100   : > { %1634 = vmatpush3.bf16.msra.mxu0 %v1846_v52 }
 0x101   : > { %1652 = vmatpush3.bf16.msra.mxu1 %v1847_v53  ;;  %1635 = vmatprep.subr.bf16.mxu0 %v2019_v2 }
 0x102   : > { %1653 = vmatprep.subr.bf16.mxu1 %v2019_v2 }
 0x104   : > { %1636 = vmatpush3.bf16.msra.mxu0 %v1848_v54 }
 0x105   : > { %1654 = vmatpush3.bf16.msra.mxu1 %v1849_v55  ;;  %1637 = vmatprep.subr.bf16.mxu0 %v2019_v2 }
 0x106   : > { %1655 = vmatprep.subr.bf16.mxu1 %v2019_v2 }
 0x108   : > { %1638 = vmatpush3.bf16.msra.mxu0 %v1850_v56 }
 0x109   : > { %1656 = vmatpush3.bf16.msra.mxu1 %v1851_v57  ;;  %1639 = vmatprep.subr.bf16.mxu0 %v2019_v2 }
 0x10a   : > { %1657 = vmatprep.subr.bf16.mxu1 %v2019_v2 }
 0x10c   : > { %1640 = vmatpush3.bf16.msra.mxu0 %v1852_v58 }
 0x10d   : > { %1658 = vmatpush3.bf16.msra.mxu1 %v1853_v59  ;;  %1641 = vmatprep.subr.bf16.mxu0 %v2019_v2 }
 0x10e   : > { %1659 = vmatprep.subr.bf16.mxu1 %v2019_v2 }
 0x110   : > { %1642 = vmatpush3.bf16.msra.mxu0 %v1854_v60 }
 0x111   : > { %1660 = vmatpush3.bf16.msra.mxu1 %v1855_v61  ;;  %1643 = vmatprep.subr.bf16.mxu0 %v2019_v2 }
 0x112   : > { %1661 = vmatprep.subr.bf16.mxu1 %v2019_v2 }
 0x114   : > { %1644 = vmatpush3.bf16.msra.mxu0 %v1856_v63 }
 0x115   : > { %1662 = vmatpush3.bf16.msra.mxu1 %v1857_v0  ;;  %1669 = vmatprep.subr.bf16.mxu0 %v2019_v2  ;;  %v1454_v0 = vld [vmem:[%s2347_s2] ss:$0 sm:$0xff] }
 0x116   : > { %1663 = vmatprep.subr.bf16.mxu1 %v2019_v2 }
 0x117   : > { %1646 = vmatmul.mubr.msk.bf16.vlgmr.msra.gmra.mrb[8].mxu0 %vm1422_vm10, %v2027_v30 }
 0x118   : > { %1670 = vmatpush3.bf16.msra.mxu0 %v1858_v3  ;;  %1685 = vmatprep.mubr.msk.bf16.mxu0 %vm2020_vm0, %v2019_v2 }
 0x119   : > { %1664 = vmatpush3.bf16.msra.mxu1 %v1859_v4  ;;  %1671 = vmatprep.subr.bf16.mxu0 %v2019_v2 }
 0x11a   : > { %1689 = vmatprep.subr.bf16.mxu1 %v2019_v2 }
 0x11c   : > { %1666 = vmatmul.mubr.msk.bf16.vlgmr.msra.gmra.mrb[8].mxu1 %vm1432_vm12, %v2027_v30  ;;  %1672 = vmatpush3.bf16.msra.mxu0 %v1860_v5 }
 0x11d   : > { %1690 = vmatpush3.bf16.msra.mxu1 %v1861_v6  ;;  %1673 = vmatprep.subr.bf16.mxu0 %v2019_v2 }
 0x11e   : > { %1691 = vmatprep.subr.bf16.mxu1 %v2019_v2  ;;  %1705 = vmatprep.mubr.msk.bf16.mxu1 %vm2020_vm0, %v2019_v2 }
 0x120   : > { %1674 = vmatpush3.bf16.msra.mxu0 %v1862_v7 }
 0x121   : > { %1692 = vmatpush3.bf16.msra.mxu1 %v1863_v8  ;;  %1675 = vmatprep.subr.bf16.mxu0 %v2019_v2 }
 0x122   : > { %1693 = vmatprep.subr.bf16.mxu1 %v2019_v2 }
 0x124   : > { %1676 = vmatpush3.bf16.msra.mxu0 %v1864_v9  ;;  %v1455_v9 = vld [vmem:[%s2349_s4] ss:$0 sm:$0xff] }
 0x125   : > { %1694 = vmatpush3.bf16.msra.mxu1 %v1865_v10  ;;  %1677 = vmatprep.subr.bf16.mxu0 %v2019_v2 }
 0x126   : > { %1695 = vmatprep.subr.bf16.mxu1 %v2019_v2 }
 0x128   : > { %1678 = vmatpush3.bf16.msra.mxu0 %v1866_v11 }
 0x129   : > { %1696 = vmatpush3.bf16.msra.mxu1 %v1867_v12  ;;  %1679 = vmatprep.subr.bf16.mxu0 %v2019_v2 }
 0x12a   : > { %1697 = vmatprep.subr.bf16.mxu1 %v2019_v2 }
 0x12c   : > { %1680 = vmatpush3.bf16.msra.mxu0 %v1868_v13 }
 0x12d   : > { %1698 = vmatpush3.bf16.msra.mxu1 %v1869_v14  ;;  %1681 = vmatprep.subr.bf16.mxu0 %v2019_v2 }
 0x12e   : > { %1699 = vmatprep.subr.bf16.mxu1 %v2019_v2 }
 0x130   : > { %1682 = vmatpush3.bf16.msra.mxu0 %v1870_v15 }
 0x131   : > { %1700 = vmatpush3.bf16.msra.mxu1 %v1871_v16  ;;  %1683 = vmatprep.subr.bf16.mxu0 %v2019_v2 }
 0x132   : > { %1701 = vmatprep.subr.bf16.mxu1 %v2019_v2 }
 0x134   : > { %1684 = vmatpush3.bf16.msra.mxu0 %v1872_v18 }
 0x135   : > { %1702 = vmatpush3.bf16.msra.mxu1 %v1873_v19  ;;  %1709 = vmatprep.subr.bf16.mxu0 %v2019_v2 }
 0x136   : > { %1703 = vmatprep.subr.bf16.mxu1 %v2019_v2 }
 0x137   : > { %1686 = vmatmul.mubr.msk.bf16.vlgmr.msra.gmra.mrb[12].mxu0 %vm1442_vm14, %v2027_v30 }
 0x138   : > { %1725 = vmatprep.mubr.msk.bf16.mxu0 %vm2020_vm0, %v2019_v2  ;;  %1710 = vmatpush3.bf16.msra.mxu0 %v1875_v22 }
 0x139   : > { %1704 = vmatpush3.bf16.msra.mxu1 %v1874_v21  ;;  %1711 = vmatprep.subr.bf16.mxu0 %v2019_v2 }
 0x13c   : > { %1706 = vmatmul.mubr.msk.bf16.vlgmr.msra.gmra.mrb[12].mxu1 %vm1452_vm1, %v2027_v30  ;;  %1712 = vmatpush3.bf16.msra.mxu0 %v1876_v23 }
 0x13d   : > { %1713 = vmatprep.subr.bf16.mxu0 %v2019_v2 }
 0x140   : > { %1714 = vmatpush3.bf16.msra.mxu0 %v1877_v24 }
 0x141   : > { %1715 = vmatprep.subr.bf16.mxu0 %v2019_v2 }
 0x144   : > { %1716 = vmatpush3.bf16.msra.mxu0 %v1878_v25 }
 0x145   : > { %1717 = vmatprep.subr.bf16.mxu0 %v2019_v2 }
 0x148   : > { %1718 = vmatpush3.bf16.msra.mxu0 %v1879_v26 }
 0x149   : > { %1719 = vmatprep.subr.bf16.mxu0 %v2019_v2 }
 0x14c   : > { %1720 = vmatpush3.bf16.msra.mxu0 %v1880_v27 }
 0x14d   : > { %1721 = vmatprep.subr.bf16.mxu0 %v2019_v2 }
 0x150   : > { %1722 = vmatpush3.bf16.msra.mxu0 %v1881_v28 }
 0x151   : > { %1723 = vmatprep.subr.bf16.mxu0 %v2019_v2 }
 0x154   : > { %1724 = vmatpush3.bf16.msra.mxu0 %v1882_v29 }
 0x1aa   : > { %v381_v30 = vpop.f32.mrb[0].mxu0 }
 0x1ab   : > { %v1567_v31 = vpop.f32.mrb[1].mxu0 }
 0x1ac   : > { %v384_v32 = vpop.f32.mrb[2].mxu0 }
 0x1ad   : > { %v1568_v33 = vpop.f32.mrb[3].mxu0 }
 0x1af   : > { %v469_v34 = vpop.f32.mrb[0].mxu1 }
 0x1b0   : > { %v470_v35 = vadd.f32 %v469_v34, %v381_v30  ;;  %v1587_v36 = vpop.f32.mrb[1].mxu1 }
 0x1b1   : > { %v472_v37 = vpop.f32.mrb[2].mxu1 }
 0x1b2   : > { %v1588_v38 = vpop.f32.mrb[3].mxu1 }
 0x1ca   : > { %v580_v39 = vpop.f32.mrb[4].mxu0 }
 0x1cb   : > { %v586_v40 = vadd.f32 %v580_v39, %v470_v35  ;;  %v1607_v41 = vpop.f32.mrb[5].mxu0 }
 0x1cc   : > { %v583_v42 = vpop.f32.mrb[6].mxu0 }
 0x1cd   : > { %v1608_v43 = vpop.f32.mrb[7].mxu0 }
 0x1cf   : > { %v692_v44 = vpop.f32.mrb[4].mxu1 }
 0x1d0   : > { %v698_v45 = vadd.f32 %v692_v44, %v586_v40  ;;  %v1627_v46 = vpop.f32.mrb[5].mxu1 }
 0x1d1   : > { %v695_v2 = vpop.f32.mrb[6].mxu1 }
 0x1d2   : > { %v1628_v47 = vpop.f32.mrb[7].mxu1 }
 0x1ea   : > { %v804_v48 = vpop.f32.mrb[8].mxu0 }
 0x1eb   : > { %v810_v49 = vadd.f32 %v804_v48, %v698_v45  ;;  %v1647_v50 = vpop.f32.mrb[9].mxu0 }
 0x1ec   : > { %v807_v51 = vpop.f32.mrb[10].mxu0 }
 0x1ed   : > { %v1648_v52 = vpop.f32.mrb[11].mxu0 }
 0x1ef   : > { %v916_v53 = vpop.f32.mrb[8].mxu1 }
 0x1f0   : > { %v922_v54 = vadd.f32 %v916_v53, %v810_v49  ;;  %v1667_v55 = vpop.f32.mrb[9].mxu1 }
 0x1f1   : > { %v919_v56 = vpop.f32.mrb[10].mxu1 }
 0x1f2   : > { %v1668_v57 = vpop.f32.mrb[11].mxu1 }
 0x20a   : > { %v1028_v58 = vpop.f32.mrb[12].mxu0 }
 0x20b   : > { %v1034_v59 = vadd.f32 %v1028_v58, %v922_v54  ;;  %v1687_v60 = vpop.f32.mrb[13].mxu0 }
 0x20c   : > { %v1031_v61 = vpop.f32.mrb[14].mxu0 }
 0x20d   : > { %v1688_v62 = vpop.f32.mrb[15].mxu0 }
 0x20f   : > { %v1140_v63 = vpop.f32.mrb[12].mxu1 }
 0x210   : > { %v1146_v1 = vadd.f32 %v1140_v63, %v1034_v59  ;;  %v1707_v3 = vpop.f32.mrb[13].mxu1 }
 0x211   : > { %v1143_v4 = vpop.f32.mrb[14].mxu1 }
 0x212   : > { %v1154_v5 = vadd.f32 %v1454_v0, %v1146_v1  ;;  %v1708_v6 = vpop.f32.mrb[15].mxu1 }
 0x214   : > { %1883 = vtanh.f32 %v1154_v5 }
 0x21e   : > { %v1884_v7 = vpop.eup %1883 }
 0x21f   : > { %v1156_v8 = vpack.c.bf16 %v1884_v7, %v1884_v7 }
 0x221   : > { %1726 = vmatmul.mubr.bf16.vlgmr.msra.gmra.mrb[16].mxu0 %v1156_v8 }
 0x2f4   : > { %v1262_v10 = vpop.f32.mrb[16].mxu0 }
 0x2f5   : > { %v1263_v11 = vadd.f32 %v1455_v9, %v1262_v10  ;;  %v1727_v12 = vpop.f32.mrb[17].mxu0 }
 0x2f6   : > { %v1265_v13 = vpop.f32.mrb[18].mxu0 }
 0x2f7   : > { %1268 = vst [vmem:[%s245_s17] sm:$0xff] %v1263_v11  ;;  %v1728_v14 = vpop.f32.mrb[19].mxu0 }
 0x2f8   : > { %1954 = shalt.err (!%p1951_p11)
}
 0x2f9   : > { %s1955_s9 = scalar_lea.hbm %s2303_s30, 128  ;;  %s1959_s13 = scalar_lea.hbm %s2350_s5, 256 }
 0x2fa   : > { %p1956_p13 = scmp.ne.s32.totalorder %s2303_s30, %s1955_s9  ;;  %p1960_p6 = scmp.lt.u32.totalorder %s2303_s30, %s2350_s5 }
 0x2fb   : > { %p1961_p9 = scmp.lt.u32.totalorder %s1959_s13, %s1955_s9  ;;  %p1963_p12 = scmp.lt.u32.totalorder %s1955_s9, %s2303_s30 }
 0x2fc   : > { %p1957_p5 = pnand %p1956_p13, %p2363_p1 }
 0x2fd   : > { %p1962_p10 = por %p1961_p9, %p1960_p6 }
 0x2fe   : > { %p1958_p0 = pneg %p1957_p5 }
 0x2ff   : > { %p1964_p2 = por %p1963_p12, %p1962_p10 }
 0x301   : > { %p1965_p3 = pnand %p1964_p2, %p1958_p0 }
 0x303   : > { %1968 = shalt.err (!%p1965_p3)
}
 0x304   : > { %1737 = dma.vmem_to_hbm [thread:$0]  (%p2363_p1), %s2305_s7, 128, %s2303_s30, %s1270_s8  }
 0x305 PF: > { %p1754_p4 = scmp.ge.s32.totalorder %s2011_s21, 2  ;;  %s1295_s16 = sand.u32 1, %s1999_s18  }
 0x306   : > { %p2364_p7 = scmp.ne.s32.totalorder %s2355_s29, 0  ;;  %s1296_s17 = scalar_lea.sflag [#allocation4], %s1295_s16 }
 0x308   : > { %p1747_p8 = pnand %p1754_p4, %p2364_p7 }
 0x30a   : > { %1994 = dma.done.wait (!%p1747_p8), %s1296_s17, 128  }
 0x30b   : > { %1996 = vsyncadd (!%p1747_p8), %s1296_s17, 4294967168  ;;  %p17_p11 = scmp.ge.s32.totalorder %s2084_s24, 4   ;;  %s2365_s18 = smov %s2003_s19 }
 0x30c   : > { %s2366_s19 = smov %s2007_s20  ;;  %s2367_s20 = smov %s2095_s27 }
 0x30d   : > { %s2368_s21 = smov %s2084_s24  ;;  %19 = sbr.rel (!%p17_p11) target bundleno = 5 (0x5), region = 91 }
 0x314   :  { %1301 = vsyncpa [#allocation3], 1 }
 0x315   :  { %1303 = vsyncpa [#allocation3 + $0x1], 1 }
 0x316   :  { %1304 = vsyncpa [#allocation6], 1 }
 0x317   :  { %1305 = vsyncpa [#allocation4], 1 }
 0x318   :  { %1307 = vsyncpa [#allocation4 + $0x1], 1 }

</bundles_post_ra>
